<compile_context>
chip_gen: v7x
topology: tpu7x:2x2x1
jax: 0.10.0
libtpu: 0.0.40
codegen_flags: <defaults>
</compile_context>

<pallas_src>
import functools

import jax
import jax.numpy as jnp
from jax import lax
from jax.experimental import pallas as pl
from jax.experimental.pallas import tpu as pltpu


def _round_up(x, m):
    return ((x + m - 1) // m) * m


# ---------------------------------------------------------------------------
# Kernel 1: dinv = 1/sqrt(rowsum(A) + 1)   (+1 is the self loop from A+I)
# Row-tiled; each block sees full rows, so degrees are exact.
# ---------------------------------------------------------------------------
def _dinv_kernel(a_ref, dinv_ref):
    deg = jnp.sum(a_ref[...].astype(jnp.float32), axis=1, keepdims=True) + 1.0
    dinv_ref[...] = lax.rsqrt(deg)


def compute_dinv(a_pad):
    n_pad = a_pad.shape[0]
    tm = 256 if n_pad % 256 == 0 else 128
    return pl.pallas_call(
        _dinv_kernel,
        out_shape=jax.ShapeDtypeStruct((n_pad, 1), jnp.float32),
        grid=(n_pad // tm,),
        in_specs=[pl.BlockSpec((tm, n_pad), lambda i: (i, 0))],
        out_specs=pl.BlockSpec((tm, 1), lambda i: (i, 0)),
        compiler_params=pltpu.CompilerParams(
            dimension_semantics=("parallel",)),
    )(a_pad)


# ---------------------------------------------------------------------------
# Kernel 2: fused GCN layer
#   acc[i,:]  = sum_k (A+I)[i,k-tile] @ (dinv[k-tile] * X[k-tile,:])      (bf16 MXU, f32 acc)
#   out[i,:]  = ReLU( (dinv[i-tile] * acc) @ W + b )                      (f32 epilogue)
#   final layer: masked softmax over the (real) feature columns.
# ---------------------------------------------------------------------------
def _gcn_layer_kernel(a_ref, x_ref, dr_ref, dc_ref, w_ref, b_ref, o_ref, acc_ref,
                      *, tm, tk, f_out_real, apply_softmax):
    i = pl.program_id(0)
    k = pl.program_id(1)

    @pl.when(k == 0)
    def _():
        acc_ref[...] = jnp.zeros_like(acc_ref)

    # A_hat tile = A tile + I restricted to this (i, k) block (global indices),
    # so the identity lands only on diagonal blocks.
    gr = lax.broadcasted_iota(jnp.int32, (tm, tk), 0) + i * tm
    gc = lax.broadcasted_iota(jnp.int32, (tm, tk), 1) + k * tk
    a_hat = (a_ref[...].astype(jnp.float32)
             + (gr == gc).astype(jnp.float32)).astype(jnp.bfloat16)

    # Column half of the symmetric normalization: scale X rows by dinv[k-block].
    x_scaled = (x_ref[...] * dc_ref[...]).astype(jnp.bfloat16)

    acc_ref[...] += jnp.dot(a_hat, x_scaled, preferred_element_type=jnp.float32)

    @pl.when(k == pl.num_programs(1) - 1)
    def _():
        h = acc_ref[...] * dr_ref[...]                       # row half of normalization, f32
        y = jnp.dot(h.astype(jnp.bfloat16), w_ref[...],
                    preferred_element_type=jnp.float32) + b_ref[...]
        y = jnp.maximum(y, 0.0)                              # ReLU, f32
        if apply_softmax:
            if f_out_real < y.shape[1]:
                col = lax.broadcasted_iota(jnp.int32, y.shape, 1)
                y = jnp.where(col < f_out_real, y, -1e30)    # mask padded feature cols
            m = jnp.max(y, axis=1, keepdims=True)
            e = jnp.exp(y - m)
            y = e * pl.reciprocal(jnp.sum(e, axis=1, keepdims=True), approx=True)
        o_ref[...] = y.astype(o_ref.dtype)


def fused_gcn_layer(a_pad, x_pad, dinv, w_pad, b_pad, *, f_out_real, apply_softmax):
    n_pad = a_pad.shape[0]
    f_in_pad = x_pad.shape[1]
    f_out_pad = w_pad.shape[1]
    tm = 256 if n_pad % 256 == 0 else 128
    tk = 512 if n_pad % 512 == 0 else tm
    grid = (n_pad // tm, n_pad // tk)

    kernel = functools.partial(
        _gcn_layer_kernel, tm=tm, tk=tk,
        f_out_real=f_out_real, apply_softmax=apply_softmax)

    return pl.pallas_call(
        kernel,
        out_shape=jax.ShapeDtypeStruct((n_pad, f_out_pad), jnp.float32),
        grid_spec=pltpu.PrefetchScalarGridSpec(
            num_scalar_prefetch=0,
            grid=grid,
            in_specs=[
                pl.BlockSpec((tm, tk), lambda i, k: (i, k)),              # A (bf16)
                pl.BlockSpec((tk, f_in_pad), lambda i, k: (k, 0)),        # X (f32)
                pl.BlockSpec((tm, 1), lambda i, k: (i, 0)),               # dinv (row blocks)
                pl.BlockSpec((tk, 1), lambda i, k: (k, 0)),               # dinv (col blocks)
                pl.BlockSpec((f_in_pad, f_out_pad), lambda i, k: (0, 0)),  # W (bf16, resident)
                pl.BlockSpec((1, f_out_pad), lambda i, k: (0, 0)),        # bias (f32, resident)
            ],
            out_specs=pl.BlockSpec((tm, f_out_pad), lambda i, k: (i, 0)),
            scratch_shapes=[pltpu.VMEM((tm, f_in_pad), jnp.float32)],
        ),
        compiler_params=pltpu.CompilerParams(
            dimension_semantics=("parallel", "arbitrary"),
            # Sized with headroom against v7x's 64 MiB physical VMEM; also lifts the
            # small default scoped limit on v5e.
            vmem_limit_bytes=48 * 1024 * 1024,
        ),
    )(a_pad, x_pad, dinv, dinv, w_pad, b_pad)


# ---------------------------------------------------------------------------
# GCN_layer forward (padding / per-layer glue in plain JAX; hot path in Pallas)
# ---------------------------------------------------------------------------
def gcn_layer_forward(x, a, params, normalized=True):
    """params: list of (W_t [F_in, F_out], b [1, F_out]) per GCN layer (f32)."""
    if not normalized:
        # Matches the PyTorch module: forward returns None when `normalized` is falsy.
        # TODO(synk): the module also print()s the layer count; omitted (no kernel equivalent).
        return None

    n, f0 = x.shape
    n_pad = _round_up(n, 128)

    # Pad A (stored bf16: 0/1 adjacency entries are exact) and X to lane-dense shapes.
    a_pad = jnp.zeros((n_pad, n_pad), jnp.bfloat16).at[:n, :n].set(a.astype(jnp.bfloat16))
    f0_pad = _round_up(f0, 128)
    x_pad = jnp.zeros((n_pad, f0_pad), jnp.float32).at[:n, :f0].set(x.astype(jnp.float32))

    dinv = compute_dinv(a_pad)          # [n_pad, 1] f32, exact full-row degrees

    num_layers = len(params)
    for li, (w_t, b) in enumerate(params):
        f_in, f_out = w_t.shape
        f_in_pad = _round_up(f_in, 128)
        f_out_pad = _round_up(f_out, 128)
        assert x_pad.shape[1] == f_in_pad
        w_pad = jnp.zeros((f_in_pad, f_out_pad), jnp.bfloat16).at[:f_in, :f_out].set(
            w_t.astype(jnp.bfloat16))
        b_pad = jnp.zeros((1, f_out_pad), jnp.float32).at[:, :f_out].set(
            b.astype(jnp.float32))
        x_pad = fused_gcn_layer(
            a_pad, x_pad, dinv, w_pad, b_pad,
            f_out_real=f_out, apply_softmax=(li == num_layers - 1))

    f_last = params[-1][0].shape[1]
    return x_pad[:n, :f_last]


def init_params(embed_dim, key):
    """Deterministic nn.Linear-like params: W [out,in] stored transposed, b as [1,out]."""
    params = []
    for i in range(len(embed_dim) - 1):
        f_in, f_out = embed_dim[i], embed_dim[i + 1]
        key, kw, kb = jax.random.split(key, 3)
        bound = 1.0 / jnp.sqrt(f_in)
        w = jax.random.uniform(kw, (f_out, f_in), jnp.float32, -bound, bound)
        b = jax.random.uniform(kb, (f_out,), jnp.float32, -bound, bound)
        params.append((w.T, b.reshape(1, f_out)))  # pre-transpose for x @ W.T
    return params


if __name__ == "__main__":
    key = jax.random.PRNGKey(0)

    # Small shapes consistent with the module (scaled-down embed_dim chain).
    N = 16                       # number of graph nodes
    embed_dim = [8, 32, 32, 64]  # scaled-down version of [2, 1024, 1024, 2048]

    key, kx, ka = jax.random.split(key, 3)
    X = jax.random.normal(kx, (N, embed_dim[0]), jnp.float32)
    # Symmetric 0/1 adjacency, no self loops (the layer adds I itself).
    A_rand = jax.random.bernoulli(ka, 0.3, (N, N)).astype(jnp.float32)
    A = jnp.triu(A_rand, 1)
    A = A + A.T

    params = init_params(embed_dim, key)

    out = gcn_layer_forward(X, A, params, normalized=True)
    out = jax.block_until_ready(out)
    assert out.shape == (N, embed_dim[-1])

    # Pure-f32 JAX reference. The kernel uses bf16 MXU inputs with f32 accumulation,
    # so tolerances are loosened accordingly.
    eye = jnp.eye(N, dtype=jnp.float32)
    a_hat = A + eye
    dinv_ref = 1.0 / jnp.sqrt(jnp.sum(a_hat, axis=1))
    a_norm = a_hat * dinv_ref[:, None] * dinv_ref[None, :]
    x_ref = X
    for w_t, b in params:
        x_ref = jnp.maximum(a_norm @ x_ref @ w_t + b, 0.0)
    ref = jax.nn.softmax(x_ref, axis=1)

    assert jnp.allclose(jnp.sum(out, axis=1), 1.0, atol=1e-2)
    assert jnp.allclose(out, ref, atol=2e-2, rtol=2e-2)

    print("KERNEL_OK")
</pallas_src>

<mosaic_0001>
module attributes {stable_mosaic.version = 11 : i64} {
  func.func @_dinv_kernel(%arg0: i32, %arg1: memref<128x128xbf16, #tpu.memory_space<vmem>>, %arg2: memref<128x1xf32, #tpu.memory_space<vmem>>) attributes {dimension_semantics = [#tpu.dimension_semantics<parallel>], iteration_bounds = array<i64: 1>, scalar_prefetch = 0 : i64, scratch_operands = 0 : i64, tpu.core_type = #tpu.core_type<tc>, window_params = [{transform_indices = @transform_0, window_bounds = array<i64: 128, 128>}, {transform_indices = @transform_1, window_bounds = array<i64: 128, 1>}]} {
    %c0 = arith.constant 0 : index
    %c0_0 = arith.constant 0 : index
    %0 = vector.load %arg1[%c0, %c0_0] : memref<128x128xbf16, #tpu.memory_space<vmem>>, vector<128x128xbf16>
    %1 = arith.extf %0 : vector<128x128xbf16> to vector<128x128xf32>
    %cst = arith.constant dense<0.000000e+00> : vector<128xf32>
    %2 = vector.multi_reduction <add>, %1, %cst [1] : vector<128x128xf32> to vector<128xf32>
    %3 = vector.shape_cast %2 : vector<128xf32> to vector<128x1xf32>
    %cst_1 = arith.constant 1.000000e+00 : f32
    %4 = vector.broadcast %cst_1 : f32 to vector<128x1xf32>
    %5 = arith.addf %3, %4 : vector<128x1xf32>
    %6 = math.rsqrt %5 : vector<128x1xf32>
    %c0_2 = arith.constant 0 : index
    %c0_3 = arith.constant 0 : index
    %7 = vector.load %arg2[%c0_2, %c0_3] : memref<128x1xf32, #tpu.memory_space<vmem>>, vector<128x1xf32>
    tpu.vector_store %arg2[%c0_2, %c0_3], %6 {strides = array<i32>} : memref<128x1xf32, #tpu.memory_space<vmem>>, vector<128x1xf32>,
    return
  }
  func.func @transform_0(%arg0: i32) -> (i32, i32) {
    %c0_i32 = arith.constant 0 : i32
    %c0_i32_0 = arith.constant 0 : i32
    return %arg0, %c0_i32 : i32, i32
  }
  func.func @transform_1(%arg0: i32) -> (i32, i32) {
    %c0_i32 = arith.constant 0 : i32
    %c0_i32_0 = arith.constant 0 : i32
    return %arg0, %c0_i32 : i32, i32
  }
}

</mosaic_0001>

<bundles_post_ra>
// kernel: tpu_custom_call.1
= control target key start
LH: loop header
LB: loop body
LE: loop exit
PB: predicated region body
PF: predicated region fallthrough
CT: control target
= control target key end

     0   :  { %6 = vsyncpa [#allocation3], 0  ;;  %s238_s6 = smov [#allocation2]   ;;  %s327_s0 = inlined_call_operand.hbm [shape: bf16[128,128], index: 0, kind: input, shape index: {}]   ;;  %s328_s1 = inlined_call_operand.vmem [shape: f32[128,1], index: 1, kind: output, shape index: {}]  }
   0x1   :  { %s12_s7 = sshll.u32 %s238_s6, 4  ;;  %s214_s10 = scalar_lea.hbm %s327_s0, 1024  ;;  %s13_s7 = int_to_ptr.vmem [resolvable:$true] %s12_s7 }
   0x2   :  { %p215_p0 = scmp.ne.s32.totalorder %s327_s0, %s214_s10  ;;  %p218_p1 = scmp.lt.u32.totalorder %s214_s10, %s327_s0 }
   0x4   :  { %p220_p2 = pnand %p218_p1, %p215_p0 }
   0x6   :  { %223 = shalt.err (!%p220_p2)
}
   0x7   :  { %s224_s15 = scalar_lea.vmem %s13_s7, 1024  ;;  %p229_p4 = scmp.lt.s32.totalorder %s13_s7, %s13_s7 }
   0x8   :  { %p225_p3 = scmp.ne.s32.totalorder %s13_s7, %s224_s15  ;;  %p230_p5 = scmp.lt.s32.totalorder %s224_s15, %s224_s15 }
   0xa   :  { %p231_p6 = por %p230_p5, %p229_p4 }
   0xc   :  { %p232_p7 = pnand %p231_p6, %p225_p3 }
   0xe   :  { %235 = shalt.err (!%p232_p7)
}
   0xf   :  { %s239_s16 = smov 64   ;;  %s240_s17 = smov 4  }
  0x10   :  { %18 = dma.hbm_to_vmem [thread:$0]  %s327_s0, 1024, %s13_s7, [#allocation3], %s239_s16, %s239_s16, %s240_s17  }
  0x11   :  { %236 = dma.done.wait [#allocation3], 1024  }
  0x12   :  { %237 = vsyncadd [#allocation3], 4294966272  ;;  %v172_v0 = vld [vmem:[#allocation2 + $0x8] sm:$0xff]   ;;  %v141_v1 = vld [vmem:[#allocation2] sm:$0xff]   ;;  %vm118_vm0 = vcmask 7168  }
  0x13   :  { %v146_v2 = vunpack.c.l.bf16 %v172_v0  ;;  %v142_v3 = vunpack.c.l.bf16 %v141_v1  ;;  %v147_v4 = vunpack.c.h.bf16 %v172_v0  ;;  %v143_v5 = vunpack.c.h.bf16 %v141_v1  ;;  %v173_v6 = vld [vmem:[#allocation2 + $0x10] sm:$0xff]   ;;  %v174_v9 = vld [vmem:[#allocation2 + $0x18] sm:$0xff]   ;;  %v175_v12 = vld [vmem:[#allocation2 + $0x20] sm:$0xff]  }
  0x14   :  { %v151_v7 = vunpack.c.h.bf16 %v173_v6  ;;  %v150_v8 = vunpack.c.l.bf16 %v173_v6  ;;  %v155_v10 = vunpack.c.h.bf16 %v174_v9  ;;  %v154_v11 = vunpack.c.l.bf16 %v174_v9  ;;  %v176_v15 = vld [vmem:[#allocation2 + $0x28] sm:$0xff]   ;;  %v177_v18 = vld [vmem:[#allocation2 + $0x30] sm:$0xff]   ;;  %v178_v21 = vld [vmem:[#allocation2 + $0x38] sm:$0xff]  }
  0x15   :  { %58 = vadd.xlane.f32.xlu1 %v146_v2  ;;  %54 = vadd.xlane.f32.xlu0 %v142_v3  ;;  %v159_v13 = vunpack.c.h.bf16 %v175_v12  ;;  %v158_v14 = vunpack.c.l.bf16 %v175_v12  ;;  %v163_v16 = vunpack.c.h.bf16 %v176_v15  ;;  %v162_v17 = vunpack.c.l.bf16 %v176_v15 }
  0x16   :  { %v167_v19 = vunpack.c.h.bf16 %v177_v18  ;;  %v166_v20 = vunpack.c.l.bf16 %v177_v18  ;;  %v171_v22 = vunpack.c.h.bf16 %v178_v21  ;;  %v170_v23 = vunpack.c.l.bf16 %v178_v21 }
  0x19   :  { %60 = vadd.xlane.f32.xlu1 %v147_v4  ;;  %56 = vadd.xlane.f32.xlu0 %v143_v5 }
  0x1d   :  { %64 = vadd.xlane.f32.xlu1 %v151_v7  ;;  %62 = vadd.xlane.f32.xlu0 %v150_v8 }
  0x21   :  { %68 = vadd.xlane.f32.xlu1 %v155_v10  ;;  %66 = vadd.xlane.f32.xlu0 %v154_v11 }
  0x25   :  { %72 = vadd.xlane.f32.xlu1 %v159_v13  ;;  %70 = vadd.xlane.f32.xlu0 %v158_v14 }
  0x29   :  { %76 = vadd.xlane.f32.xlu1 %v163_v16  ;;  %74 = vadd.xlane.f32.xlu0 %v162_v17 }
  0x2d   :  { %80 = vadd.xlane.f32.xlu1 %v167_v19  ;;  %78 = vadd.xlane.f32.xlu0 %v166_v20 }
  0x31   :  { %84 = vadd.xlane.f32.xlu1 %v171_v22  ;;  %82 = vadd.xlane.f32.xlu0 %v170_v23 }
  0xa2   :  { %v59_v24 = vpop.xlane.xlu1 %58  ;;  %v55_v25 = vpop.xlane.xlu0 %54 }
  0xa3   :  { %v88_v26 = vadd.f32 1.0, %v59_v24  ;;  %v86_v27 = vadd.f32 1.0, %v55_v25 }
  0xa5   :  { %182 = vrsqrt.f32 %v88_v26 }
  0xa6   :  { %184 = vrsqrt.f32 %v86_v27  ;;  %v61_v28 = vpop.xlane.xlu1 %60  ;;  %v57_v29 = vpop.xlane.xlu0 %56 }
  0xa7   :  { %v89_v30 = vadd.f32 1.0, %v61_v28  ;;  %v87_v31 = vadd.f32 1.0, %v57_v29 }
  0xa9   :  { %186 = vrsqrt.f32 %v89_v30 }
  0xaa   :  { %188 = vrsqrt.f32 %v87_v31  ;;  %v65_v32 = vpop.xlane.xlu1 %64  ;;  %v63_v33 = vpop.xlane.xlu0 %62 }
  0xab   :  { %v91_v34 = vadd.f32 1.0, %v65_v32  ;;  %v90_v35 = vadd.f32 1.0, %v63_v33 }
  0xad   :  { %190 = vrsqrt.f32 %v91_v34 }
  0xae   :  { %192 = vrsqrt.f32 %v90_v35  ;;  %v69_v36 = vpop.xlane.xlu1 %68  ;;  %v67_v37 = vpop.xlane.xlu0 %66 }
  0xaf   :  { %v183_v38 = vpop.eup %182  ;;  %v93_v39 = vadd.f32 1.0, %v69_v36  ;;  %v92_v40 = vadd.f32 1.0, %v67_v37 }
  0xb0   :  { %v185_v41 = vpop.eup %184  ;;  %121 = vst.msk [vmem:[%s328_s1 + $0x10] sm:$0xff] %vm118_vm0, %v183_v38 }
  0xb1   :  { %119 = vst.msk [vmem:[%s328_s1] sm:$0xff] %vm118_vm0, %v185_v41  ;;  %194 = vrsqrt.f32 %v93_v39 }
  0xb2   :  { %196 = vrsqrt.f32 %v92_v40  ;;  %v73_v42 = vpop.xlane.xlu1 %72  ;;  %v71_v43 = vpop.xlane.xlu0 %70 }
  0xb3   :  { %v187_v44 = vpop.eup %186  ;;  %v95_v45 = vadd.f32 1.0, %v73_v42  ;;  %v94_v46 = vadd.f32 1.0, %v71_v43 }
  0xb4   :  { %v189_v47 = vpop.eup %188  ;;  %122 = vst.msk [vmem:[%s328_s1 + $0x18] sm:$0xff] %vm118_vm0, %v187_v44 }
  0xb5   :  { %120 = vst.msk [vmem:[%s328_s1 + $0x8] sm:$0xff] %vm118_vm0, %v189_v47  ;;  %198 = vrsqrt.f32 %v95_v45 }
  0xb6   :  { %200 = vrsqrt.f32 %v94_v46  ;;  %v77_v48 = vpop.xlane.xlu1 %76  ;;  %v75_v49 = vpop.xlane.xlu0 %74 }
  0xb7   :  { %v191_v50 = vpop.eup %190  ;;  %v97_v51 = vadd.f32 1.0, %v77_v48  ;;  %v96_v52 = vadd.f32 1.0, %v75_v49 }
  0xb8   :  { %v193_v53 = vpop.eup %192  ;;  %124 = vst.msk [vmem:[%s328_s1 + $0x28] sm:$0xff] %vm118_vm0, %v191_v50 }
  0xb9   :  { %123 = vst.msk [vmem:[%s328_s1 + $0x20] sm:$0xff] %vm118_vm0, %v193_v53  ;;  %202 = vrsqrt.f32 %v97_v51 }
  0xba   :  { %204 = vrsqrt.f32 %v96_v52  ;;  %v81_v54 = vpop.xlane.xlu1 %80  ;;  %v79_v55 = vpop.xlane.xlu0 %78 }
  0xbb   :  { %v195_v56 = vpop.eup %194  ;;  %v99_v57 = vadd.f32 1.0, %v81_v54  ;;  %v98_v58 = vadd.f32 1.0, %v79_v55 }
  0xbc   :  { %v197_v59 = vpop.eup %196  ;;  %126 = vst.msk [vmem:[%s328_s1 + $0x38] sm:$0xff] %vm118_vm0, %v195_v56 }
  0xbd   :  { %125 = vst.msk [vmem:[%s328_s1 + $0x30] sm:$0xff] %vm118_vm0, %v197_v59  ;;  %206 = vrsqrt.f32 %v99_v57 }
  0xbe   :  { %208 = vrsqrt.f32 %v98_v58  ;;  %v85_v60 = vpop.xlane.xlu1 %84  ;;  %v83_v61 = vpop.xlane.xlu0 %82 }
  0xbf   :  { %v199_v62 = vpop.eup %198  ;;  %v101_v63 = vadd.f32 1.0, %v85_v60  ;;  %v100_v0 = vadd.f32 1.0, %v83_v61 }
  0xc0   :  { %v201_v1 = vpop.eup %200  ;;  %128 = vst.msk [vmem:[%s328_s1 + $0x48] sm:$0xff] %vm118_vm0, %v199_v62 }
  0xc1   :  { %127 = vst.msk [vmem:[%s328_s1 + $0x40] sm:$0xff] %vm118_vm0, %v201_v1  ;;  %210 = vrsqrt.f32 %v101_v63 }
  0xc2   :  { %212 = vrsqrt.f32 %v100_v0 }
  0xc3   :  { %v203_v2 = vpop.eup %202 }
  0xc4   :  { %v205_v3 = vpop.eup %204  ;;  %130 = vst.msk [vmem:[%s328_s1 + $0x58] sm:$0xff] %vm118_vm0, %v203_v2 }
  0xc5   :  { %129 = vst.msk [vmem:[%s328_s1 + $0x50] sm:$0xff] %vm118_vm0, %v205_v3 }
  0xc7   :  { %v207_v4 = vpop.eup %206 }
  0xc8   :  { %v209_v5 = vpop.eup %208  ;;  %132 = vst.msk [vmem:[%s328_s1 + $0x68] sm:$0xff] %vm118_vm0, %v207_v4 }
  0xc9   :  { %131 = vst.msk [vmem:[%s328_s1 + $0x60] sm:$0xff] %vm118_vm0, %v209_v5 }
  0xcb   :  { %v211_v6 = vpop.eup %210 }
  0xcc   :  { %v213_v7 = vpop.eup %212  ;;  %134 = vst.msk [vmem:[%s328_s1 + $0x78] sm:$0xff] %vm118_vm0, %v211_v6 }
  0xcd   :  { %133 = vst.msk [vmem:[%s328_s1 + $0x70] sm:$0xff] %vm118_vm0, %v213_v7 }
  0xce   :  { %139 = vsyncpa [#allocation3], 1 }

</bundles_post_ra>
